<compile_context>
chip_gen: v7x
topology: tpu7x:2x2x1
jax: 0.10.0
libtpu: 0.0.40
codegen_flags: <defaults>
</compile_context>

<pallas_src>
import math

import jax
import jax.numpy as jnp
import numpy as np
from jax.experimental import pallas as pl
from jax.experimental.pallas import tpu as pltpu

# ---- small synthetic config (one CLIP-style resblock) ----
L, N, D = 8, 2, 32        # seq (incl. CLS), batch, width
HEADS = 4
DH = D // HEADS
MLP = 4 * D
E = 16                    # projection (embed) dim
EPS = 1e-5
ATTN_SCALE = 1.0 / math.sqrt(DH)

# rows of the packed width-D vector operand
(R_LN1W, R_LN1B, R_LN2W, R_LN2B, R_LNPW, R_LNPB,
 R_BOUT, R_BFC2, R_BQ, R_BK, R_BV) = range(11)
VEC_ROWS = 16             # padded to a multiple of 8 sublanes


def _layer_norm(x, w, b):
    mu = jnp.mean(x, axis=-1, keepdims=True)
    var = jnp.mean((x - mu) ** 2, axis=-1, keepdims=True)
    return (x - mu) * jax.lax.rsqrt(var + EPS) * w + b


# --------------------------------------------------------------------------
# Fused kernel: one grid step == one batch element (resblock + CLS head).
# x_ref block is (1, L, D); all weight operands are resident (constant maps).
# --------------------------------------------------------------------------
def set_target_kernel(x_ref, vec_ref, wqkvo_ref, wfc1b_ref, wfc2_ref, proj_ref,
                      o_ref):
    x = x_ref[0]                                   # (L, D) this batch element
    vec = vec_ref[...]                             # (VEC_ROWS, D)

    def row(r):                                    # (1, D) static row slice
        return vec[r:r + 1, :]

    # --- attention branch: x + out_proj(MHA(ln_1(x))) ---
    h = _layer_norm(x, row(R_LN1W), row(R_LN1B))
    # 1/sqrt(DH) already folded into the Q weights/bias at pack time.
    q = jnp.dot(h, wqkvo_ref[0], preferred_element_type=jnp.float32) + row(R_BQ)
    k = jnp.dot(h, wqkvo_ref[1], preferred_element_type=jnp.float32) + row(R_BK)
    v = jnp.dot(h, wqkvo_ref[2], preferred_element_type=jnp.float32) + row(R_BV)
    wout = wqkvo_ref[3]                            # (D, D)

    attn = row(R_BOUT)                             # accumulator seeded with bias
    for hh in range(HEADS):                        # static, tiny
        sl = slice(hh * DH, (hh + 1) * DH)
        # scores over this batch's L rows only; no mask needed
        s = jnp.einsum('ld,md->lm', q[:, sl], k[:, sl],
                       preferred_element_type=jnp.float32)         # (L, L)
        s = s - jnp.max(s, axis=-1, keepdims=True)
        p = jnp.exp(s)
        p = p * pl.reciprocal(jnp.sum(p, axis=-1, keepdims=True), approx=True)
        pv = jnp.dot(p, v[:, sl], preferred_element_type=jnp.float32)  # (L, DH)
        # out-projection folded into the head loop (no concatenate);
        # w_out row slice is sublane-tile aligned (DH = 8).
        attn = attn + jnp.dot(pv, wout[sl, :],
                              preferred_element_type=jnp.float32)      # (L, D)
    x = x + attn

    # --- MLP branch: x + mlp(ln_2(x)) with QuickGELU (OpenAI CLIP) ---
    h2 = _layer_norm(x, row(R_LN2W), row(R_LN2B))
    h2 = jnp.dot(h2, wfc1b_ref[:D, :],
                 preferred_element_type=jnp.float32) + wfc1b_ref[D:D + 1, :]
    h2 = h2 * jax.nn.sigmoid(1.702 * h2)
    h2 = jnp.dot(h2, wfc2_ref[...],
                 preferred_element_type=jnp.float32) + row(R_BFC2)
    x = x + h2

    # --- head: CLS token (row 0) -> ln_post -> proj -> L2 normalize ---
    cls = x[0:1, :]                                                 # (1, D)
    zc = _layer_norm(cls, row(R_LNPW), row(R_LNPB))
    out = jnp.dot(zc, proj_ref[...], preferred_element_type=jnp.float32)  # (1, E)
    # eps guard against a degenerate all-zero embedding (negligible otherwise)
    inv = jax.lax.rsqrt(jnp.sum(out * out, axis=-1, keepdims=True) + 1e-12)
    o_ref[0] = out * inv


# --------------------------------------------------------------------------
# One-time host-side packing: 15 weight arrays -> 5 kernel operands.
# --------------------------------------------------------------------------
def pack_params(p):
    zeros = lambda r, c: jnp.zeros((r, c), jnp.float32)
    vec = jnp.concatenate([
        p['ln1_w'], p['ln1_b'], p['ln2_w'], p['ln2_b'],
        p['lnp_w'], p['lnp_b'], p['b_out'], p['b_fc2'],
        p['b_qkv'][:, :D] * ATTN_SCALE,            # scaled Q bias
        p['b_qkv'][:, D:2 * D], p['b_qkv'][:, 2 * D:],
        zeros(VEC_ROWS - 11, D)], axis=0).astype(jnp.float32)        # (16, D)
    wqkvo = jnp.stack([
        p['w_qkv'][:, :D] * ATTN_SCALE,            # scaled Q weights
        p['w_qkv'][:, D:2 * D],
        p['w_qkv'][:, 2 * D:],
        p['w_out']], axis=0).astype(jnp.float32)                     # (4, D, D)
    wfc1b = jnp.concatenate([p['w_fc1'], p['b_fc1'],
                             zeros(7, MLP)], axis=0).astype(jnp.float32)  # (D+8, MLP)
    return (vec, wqkvo, wfc1b,
            p['w_fc2'].astype(jnp.float32), p['proj'].astype(jnp.float32))


def set_target_forward(z_lnd, packed):
    vec, wqkvo, wfc1b, wfc2, proj = packed
    # LND -> NLD so each grid step gets one batch element's contiguous (L, D);
    # tiny XLA transpose, outside the kernel (matches the module's permute).
    x_nld = jnp.transpose(z_lnd, (1, 0, 2))
    out = pl.pallas_call(
        set_target_kernel,
        grid=(N,),
        in_specs=[
            pl.BlockSpec((1, L, D), lambda n: (n, 0, 0)),
            pl.BlockSpec((VEC_ROWS, D), lambda n: (0, 0)),      # resident
            pl.BlockSpec((4, D, D), lambda n: (0, 0, 0)),       # resident
            pl.BlockSpec((D + 8, MLP), lambda n: (0, 0)),       # resident
            pl.BlockSpec((MLP, D), lambda n: (0, 0)),           # resident
            pl.BlockSpec((D, E), lambda n: (0, 0)),             # resident
        ],
        out_specs=pl.BlockSpec((1, 1, E), lambda n: (n, 0, 0)),
        out_shape=jax.ShapeDtypeStruct((N, 1, E), jnp.float32),
        compiler_params=pltpu.CompilerParams(
            dimension_semantics=("parallel",)),
    )(x_nld, vec, wqkvo, wfc1b, wfc2, proj)
    return out.reshape(N, E)


set_target_forward_jit = jax.jit(set_target_forward)


# --------------------------------------------------------------------------
# Pure-JAX reference (for correctness check) — unpacked params, LND input.
# --------------------------------------------------------------------------
def ref_forward(z_lnd, p):
    def ln(x, w, b):
        mu = x.mean(-1, keepdims=True)
        var = ((x - mu) ** 2).mean(-1, keepdims=True)
        return (x - mu) / jnp.sqrt(var + EPS) * w + b

    x = jnp.transpose(z_lnd, (1, 0, 2))
    h = ln(x, p['ln1_w'][0], p['ln1_b'][0])
    qkv = h @ p['w_qkv'] + p['b_qkv'][0]
    q, k, v = jnp.split(qkv, 3, axis=-1)
    q = q.reshape(N, L, HEADS, DH).transpose(0, 2, 1, 3) / math.sqrt(DH)
    k = k.reshape(N, L, HEADS, DH).transpose(0, 2, 1, 3)
    v = v.reshape(N, L, HEADS, DH).transpose(0, 2, 1, 3)
    s = q @ jnp.swapaxes(k, -1, -2)
    a = jax.nn.softmax(s, axis=-1) @ v
    a = a.transpose(0, 2, 1, 3).reshape(N, L, D)
    x = x + (a @ p['w_out'] + p['b_out'][0])
    h2 = ln(x, p['ln2_w'][0], p['ln2_b'][0])
    h2 = h2 @ p['w_fc1'] + p['b_fc1'][0]
    h2 = h2 * jax.nn.sigmoid(1.702 * h2)
    x = x + (h2 @ p['w_fc2'] + p['b_fc2'][0])
    cls = x[:, 0, :]
    out = ln(cls, p['lnp_w'][0], p['lnp_b'][0]) @ p['proj']
    return out / jnp.linalg.norm(out, axis=-1, keepdims=True)


if __name__ == "__main__":
    key = jax.random.PRNGKey(0)
    ks = jax.random.split(key, 12)

    def init(k, shape, scale=0.05):
        return (scale * jax.random.normal(k, shape)).astype(jnp.float32)

    # deterministic synthetic weights (shapes from CLIP ResidualAttentionBlock,
    # pre-transposed to right-multiply form; biases kept 2D (1, K))
    params = dict(
        ln1_w=jnp.ones((1, D), jnp.float32) + init(ks[0], (1, D), 0.01),
        ln1_b=init(ks[1], (1, D), 0.01),
        w_qkv=init(ks[2], (D, 3 * D)), b_qkv=init(ks[3], (1, 3 * D)),
        w_out=init(ks[4], (D, D)), b_out=init(ks[5], (1, D)),
        ln2_w=jnp.ones((1, D), jnp.float32), ln2_b=jnp.zeros((1, D), jnp.float32),
        w_fc1=init(ks[6], (D, MLP)), b_fc1=init(ks[7], (1, MLP)),
        w_fc2=init(ks[8], (MLP, D)), b_fc2=init(ks[9], (1, D)),
        lnp_w=jnp.ones((1, D), jnp.float32), lnp_b=jnp.zeros((1, D), jnp.float32),
        proj=init(ks[10], (D, E), 0.2),
    )

    # z is the pre-extracted transformer feature (LND), as get_feature() returns
    z = jax.random.normal(ks[11], (L, N, D), dtype=jnp.float32)

    packed = jax.tree_util.tree_map(jax.block_until_ready, pack_params(params))

    out = jax.block_until_ready(set_target_forward_jit(z, packed))
    ref = jax.block_until_ready(ref_forward(z, params))

    np.testing.assert_allclose(np.asarray(out), np.asarray(ref),
                               rtol=1e-4, atol=1e-4)
    assert out.shape == (N, E)
    print("KERNEL_OK")
</pallas_src>

<mosaic_0001>
module attributes {stable_mosaic.version = 11 : i64} {
  func.func @set_target_kernel(%arg0: i32, %arg1: memref<1x8x32xf32, #tpu.memory_space<vmem>>, %arg2: memref<16x32xf32, #tpu.memory_space<vmem>>, %arg3: memref<4x32x32xf32, #tpu.memory_space<vmem>>, %arg4: memref<40x128xf32, #tpu.memory_space<vmem>>, %arg5: memref<128x32xf32, #tpu.memory_space<vmem>>, %arg6: memref<32x16xf32, #tpu.memory_space<vmem>>, %arg7: memref<1x1x16xf32, #tpu.memory_space<vmem>>) attributes {dimension_semantics = [#tpu.dimension_semantics<parallel>], iteration_bounds = array<i64: 2>, scalar_prefetch = 0 : i64, scratch_operands = 0 : i64, tpu.core_type = #tpu.core_type<tc>, window_params = [{transform_indices = @transform_0, window_bounds = array<i64: 1, 8, 32>}, {pipeline_mode = #tpu.pipeline_mode<synchronous>, transform_indices = @transform_1, window_bounds = array<i64: 16, 32>}, {pipeline_mode = #tpu.pipeline_mode<synchronous>, transform_indices = @transform_2, window_bounds = array<i64: 4, 32, 32>}, {pipeline_mode = #tpu.pipeline_mode<synchronous>, transform_indices = @transform_3, window_bounds = array<i64: 40, 128>}, {pipeline_mode = #tpu.pipeline_mode<synchronous>, transform_indices = @transform_4, window_bounds = array<i64: 128, 32>}, {pipeline_mode = #tpu.pipeline_mode<synchronous>, transform_indices = @transform_5, window_bounds = array<i64: 32, 16>}, {transform_indices = @transform_6, window_bounds = array<i64: 1, 1, 16>}]} {
    %c0 = arith.constant 0 : index
    %c0_0 = arith.constant 0 : index
    %c0_1 = arith.constant 0 : index
    %0 = vector.load %arg1[%c0, %c0_0, %c0_1] : memref<1x8x32xf32, #tpu.memory_space<vmem>>, vector<1x8x32xf32>
    %1 = vector.shape_cast %0 : vector<1x8x32xf32> to vector<8x32xf32>
    %c0_2 = arith.constant 0 : index
    %c0_3 = arith.constant 0 : index
    %2 = vector.load %arg2[%c0_2, %c0_3] : memref<16x32xf32, #tpu.memory_space<vmem>>, vector<16x32xf32>
    %3 = vector.extract_strided_slice %2 {offsets = [0, 0], sizes = [1, 32], strides = [1, 1]} : vector<16x32xf32> to vector<1x32xf32>
    %4 = vector.extract_strided_slice %2 {offsets = [1, 0], sizes = [1, 32], strides = [1, 1]} : vector<16x32xf32> to vector<1x32xf32>
    %cst = arith.constant dense<0.000000e+00> : vector<8xf32>
    %5 = vector.multi_reduction <add>, %1, %cst [1] : vector<8x32xf32> to vector<8xf32>
    %6 = vector.shape_cast %5 : vector<8xf32> to vector<8x1xf32>
    %cst_4 = arith.constant 3.200000e+01 : f32
    %7 = vector.broadcast %cst_4 : f32 to vector<8x1xf32>
    %8 = arith.divf %6, %7 : vector<8x1xf32>
    %9 = vector.broadcast %8 : vector<8x1xf32> to vector<8x32xf32>
    %10 = arith.subf %1, %9 : vector<8x32xf32>
    %11 = arith.mulf %10, %10 : vector<8x32xf32>
    %cst_5 = arith.constant dense<0.000000e+00> : vector<8xf32>
    %12 = vector.multi_reduction <add>, %11, %cst_5 [1] : vector<8x32xf32> to vector<8xf32>
    %13 = vector.shape_cast %12 : vector<8xf32> to vector<8x1xf32>
    %cst_6 = arith.constant 3.200000e+01 : f32
    %14 = vector.broadcast %cst_6 : f32 to vector<8x1xf32>
    %15 = arith.divf %13, %14 : vector<8x1xf32>
    %16 = vector.broadcast %8 : vector<8x1xf32> to vector<8x32xf32>
    %17 = arith.subf %1, %16 : vector<8x32xf32>
    %cst_7 = arith.constant 9.99999974E-6 : f32
    %18 = vector.broadcast %cst_7 : f32 to vector<8x1xf32>
    %19 = arith.addf %15, %18 : vector<8x1xf32>
    %20 = math.rsqrt %19 : vector<8x1xf32>
    %21 = vector.broadcast %20 : vector<8x1xf32> to vector<8x32xf32>
    %22 = arith.mulf %17, %21 : vector<8x32xf32>
    %23 = vector.broadcast %3 : vector<1x32xf32> to vector<8x32xf32>
    %24 = arith.mulf %22, %23 : vector<8x32xf32>
    %25 = vector.broadcast %4 : vector<1x32xf32> to vector<8x32xf32>
    %26 = arith.addf %24, %25 : vector<8x32xf32>
    %c0_8 = arith.constant 0 : index
    %c0_9 = arith.constant 0 : index
    %c0_10 = arith.constant 0 : index
    %27 = vector.load %arg3[%c0_8, %c0_9, %c0_10] : memref<4x32x32xf32, #tpu.memory_space<vmem>>, vector<1x32x32xf32>
    %28 = vector.shape_cast %27 : vector<1x32x32xf32> to vector<32x32xf32>
    %cst_11 = arith.constant dense<0.000000e+00> : vector<8x32xf32>
    %29 = tpu.matmul %26, %28, %cst_11 {dimension_numbers = #tpu.dot_dimension_numbers<[1], [0], [0], [1], [0, 0, 1, 1], [], []>} : vector<8x32xf32>, vector<32x32xf32>, vector<8x32xf32> -> vector<8x32xf32>
    %30 = vector.extract_strided_slice %2 {offsets = [8, 0], sizes = [1, 32], strides = [1, 1]} : vector<16x32xf32> to vector<1x32xf32>
    %31 = vector.broadcast %30 : vector<1x32xf32> to vector<8x32xf32>
    %32 = arith.addf %29, %31 : vector<8x32xf32>
    %c1 = arith.constant 1 : index
    %c0_12 = arith.constant 0 : index
    %c0_13 = arith.constant 0 : index
    %33 = vector.load %arg3[%c1, %c0_12, %c0_13] : memref<4x32x32xf32, #tpu.memory_space<vmem>>, vector<1x32x32xf32>
    %34 = vector.shape_cast %33 : vector<1x32x32xf32> to vector<32x32xf32>
    %cst_14 = arith.constant dense<0.000000e+00> : vector<8x32xf32>
    %35 = tpu.matmul %26, %34, %cst_14 {dimension_numbers = #tpu.dot_dimension_numbers<[1], [0], [0], [1], [0, 0, 1, 1], [], []>} : vector<8x32xf32>, vector<32x32xf32>, vector<8x32xf32> -> vector<8x32xf32>
    %36 = vector.extract_strided_slice %2 {offsets = [9, 0], sizes = [1, 32], strides = [1, 1]} : vector<16x32xf32> to vector<1x32xf32>
    %37 = vector.broadcast %36 : vector<1x32xf32> to vector<8x32xf32>
    %38 = arith.addf %35, %37 : vector<8x32xf32>
    %c2 = arith.constant 2 : index
    %c0_15 = arith.constant 0 : index
    %c0_16 = arith.constant 0 : index
    %39 = vector.load %arg3[%c2, %c0_15, %c0_16] : memref<4x32x32xf32, #tpu.memory_space<vmem>>, vector<1x32x32xf32>
    %40 = vector.shape_cast %39 : vector<1x32x32xf32> to vector<32x32xf32>
    %cst_17 = arith.constant dense<0.000000e+00> : vector<8x32xf32>
    %41 = tpu.matmul %26, %40, %cst_17 {dimension_numbers = #tpu.dot_dimension_numbers<[1], [0], [0], [1], [0, 0, 1, 1], [], []>} : vector<8x32xf32>, vector<32x32xf32>, vector<8x32xf32> -> vector<8x32xf32>
    %42 = vector.extract_strided_slice %2 {offsets = [10, 0], sizes = [1, 32], strides = [1, 1]} : vector<16x32xf32> to vector<1x32xf32>
    %43 = vector.broadcast %42 : vector<1x32xf32> to vector<8x32xf32>
    %44 = arith.addf %41, %43 : vector<8x32xf32>
    %c3 = arith.constant 3 : index
    %c0_18 = arith.constant 0 : index
    %c0_19 = arith.constant 0 : index
    %45 = vector.load %arg3[%c3, %c0_18, %c0_19] : memref<4x32x32xf32, #tpu.memory_space<vmem>>, vector<1x32x32xf32>
    %46 = vector.shape_cast %45 : vector<1x32x32xf32> to vector<32x32xf32>
    %47 = vector.extract_strided_slice %2 {offsets = [6, 0], sizes = [1, 32], strides = [1, 1]} : vector<16x32xf32> to vector<1x32xf32>
    %48 = vector.extract_strided_slice %32 {offsets = [0, 0], sizes = [8, 8], strides = [1, 1]} : vector<8x32xf32> to vector<8x8xf32>
    %49 = vector.extract_strided_slice %38 {offsets = [0, 0], sizes = [8, 8], strides = [1, 1]} : vector<8x32xf32> to vector<8x8xf32>
    "tpu.trace_start"() <{level = 10 : i32, message = "ld,md->lm"}> : () -> ()
    %cst_20 = arith.constant dense<0.000000e+00> : vector<8x8xf32>
    %50 = tpu.matmul %48, %49, %cst_20 {dimension_numbers = #tpu.dot_dimension_numbers<[1], [1], [0], [0], [0, 0, 1, 0], [], []>} : vector<8x8xf32>, vector<8x8xf32>, vector<8x8xf32> -> vector<8x8xf32>
    "tpu.trace_stop"() : () -> ()
    %cst_21 = arith.constant dense<0xFF800000> : vector<8xf32>
    %51 = vector.multi_reduction <maximumf>, %50, %cst_21 [1] : vector<8x8xf32> to vector<8xf32>
    %52 = vector.shape_cast %51 : vector<8xf32> to vector<8x1xf32>
    %53 = vector.broadcast %52 : vector<8x1xf32> to vector<8x8xf32>
    %54 = arith.subf %50, %53 : vector<8x8xf32>
    %55 = math.exp %54 : vector<8x8xf32>
    %cst_22 = arith.constant dense<0.000000e+00> : vector<8xf32>
    %56 = vector.multi_reduction <add>, %55, %cst_22 [1] : vector<8x8xf32> to vector<8xf32>
    %57 = vector.shape_cast %56 : vector<8xf32> to vector<8x1xf32>
    %58 = tpu.reciprocal %57 {approx = true} : vector<8x1xf32> -> vector<8x1xf32>
    %59 = vector.broadcast %58 : vector<8x1xf32> to vector<8x8xf32>
    %60 = arith.mulf %55, %59 : vector<8x8xf32>
    %61 = vector.extract_strided_slice %44 {offsets = [0, 0], sizes = [8, 8], strides = [1, 1]} : vector<8x32xf32> to vector<8x8xf32>
    %cst_23 = arith.constant dense<0.000000e+00> : vector<8x8xf32>
    %62 = tpu.matmul %60, %61, %cst_23 {dimension_numbers = #tpu.dot_dimension_numbers<[1], [0], [0], [1], [0, 0, 1, 1], [], []>} : vector<8x8xf32>, vector<8x8xf32>, vector<8x8xf32> -> vector<8x8xf32>
    %63 = vector.extract_strided_slice %46 {offsets = [0, 0], sizes = [8, 32], strides = [1, 1]} : vector<32x32xf32> to vector<8x32xf32>
    %cst_24 = arith.constant dense<0.000000e+00> : vector<8x32xf32>
    %64 = tpu.matmul %62, %63, %cst_24 {dimension_numbers = #tpu.dot_dimension_numbers<[1], [0], [0], [1], [0, 0, 1, 1], [], []>} : vector<8x8xf32>, vector<8x32xf32>, vector<8x32xf32> -> vector<8x32xf32>
    %65 = vector.broadcast %47 : vector<1x32xf32> to vector<8x32xf32>
    %66 = arith.addf %65, %64 : vector<8x32xf32>
    %67 = vector.extract_strided_slice %32 {offsets = [0, 8], sizes = [8, 8], strides = [1, 1]} : vector<8x32xf32> to vector<8x8xf32>
    %68 = vector.extract_strided_slice %38 {offsets = [0, 8], sizes = [8, 8], strides = [1, 1]} : vector<8x32xf32> to vector<8x8xf32>
    "tpu.trace_start"() <{level = 10 : i32, message = "ld,md->lm"}> : () -> ()
    %cst_25 = arith.constant dense<0.000000e+00> : vector<8x8xf32>
    %69 = tpu.matmul %67, %68, %cst_25 {dimension_numbers = #tpu.dot_dimension_numbers<[1], [1], [0], [0], [0, 0, 1, 0], [], []>} : vector<8x8xf32>, vector<8x8xf32>, vector<8x8xf32> -> vector<8x8xf32>
    "tpu.trace_stop"() : () -> ()
    %cst_26 = arith.constant dense<0xFF800000> : vector<8xf32>
    %70 = vector.multi_reduction <maximumf>, %69, %cst_26 [1] : vector<8x8xf32> to vector<8xf32>
    %71 = vector.shape_cast %70 : vector<8xf32> to vector<8x1xf32>
    %72 = vector.broadcast %71 : vector<8x1xf32> to vector<8x8xf32>
    %73 = arith.subf %69, %72 : vector<8x8xf32>
    %74 = math.exp %73 : vector<8x8xf32>
    %cst_27 = arith.constant dense<0.000000e+00> : vector<8xf32>
    %75 = vector.multi_reduction <add>, %74, %cst_27 [1] : vector<8x8xf32> to vector<8xf32>
    %76 = vector.shape_cast %75 : vector<8xf32> to vector<8x1xf32>
    %77 = tpu.reciprocal %76 {approx = true} : vector<8x1xf32> -> vector<8x1xf32>
    %78 = vector.broadcast %77 : vector<8x1xf32> to vector<8x8xf32>
    %79 = arith.mulf %74, %78 : vector<8x8xf32>
    %80 = vector.extract_strided_slice %44 {offsets = [0, 8], sizes = [8, 8], strides = [1, 1]} : vector<8x32xf32> to vector<8x8xf32>
    %cst_28 = arith.constant dense<0.000000e+00> : vector<8x8xf32>
    %81 = tpu.matmul %79, %80, %cst_28 {dimension_numbers = #tpu.dot_dimension_numbers<[1], [0], [0], [1], [0, 0, 1, 1], [], []>} : vector<8x8xf32>, vector<8x8xf32>, vector<8x8xf32> -> vector<8x8xf32>
    %82 = vector.extract_strided_slice %46 {offsets = [8, 0], sizes = [8, 32], strides = [1, 1]} : vector<32x32xf32> to vector<8x32xf32>
    %cst_29 = arith.constant dense<0.000000e+00> : vector<8x32xf32>
    %83 = tpu.matmul %81, %82, %cst_29 {dimension_numbers = #tpu.dot_dimension_numbers<[1], [0], [0], [1], [0, 0, 1, 1], [], []>} : vector<8x8xf32>, vector<8x32xf32>, vector<8x32xf32> -> vector<8x32xf32>
    %84 = arith.addf %66, %83 : vector<8x32xf32>
    %85 = vector.extract_strided_slice %32 {offsets = [0, 16], sizes = [8, 8], strides = [1, 1]} : vector<8x32xf32> to vector<8x8xf32>
    %86 = vector.extract_strided_slice %38 {offsets = [0, 16], sizes = [8, 8], strides = [1, 1]} : vector<8x32xf32> to vector<8x8xf32>
    "tpu.trace_start"() <{level = 10 : i32, message = "ld,md->lm"}> : () -> ()
    %cst_30 = arith.constant dense<0.000000e+00> : vector<8x8xf32>
    %87 = tpu.matmul %85, %86, %cst_30 {dimension_numbers = #tpu.dot_dimension_numbers<[1], [1], [0], [0], [0, 0, 1, 0], [], []>} : vector<8x8xf32>, vector<8x8xf32>, vector<8x8xf32> -> vector<8x8xf32>
    "tpu.trace_stop"() : () -> ()
    %cst_31 = arith.constant dense<0xFF800000> : vector<8xf32>
    %88 = vector.multi_reduction <maximumf>, %87, %cst_31 [1] : vector<8x8xf32> to vector<8xf32>
    %89 = vector.shape_cast %88 : vector<8xf32> to vector<8x1xf32>
    %90 = vector.broadcast %89 : vector<8x1xf32> to vector<8x8xf32>
    %91 = arith.subf %87, %90 : vector<8x8xf32>
    %92 = math.exp %91 : vector<8x8xf32>
    %cst_32 = arith.constant dense<0.000000e+00> : vector<8xf32>
    %93 = vector.multi_reduction <add>, %92, %cst_32 [1] : vector<8x8xf32> to vector<8xf32>
    %94 = vector.shape_cast %93 : vector<8xf32> to vector<8x1xf32>
    %95 = tpu.reciprocal %94 {approx = true} : vector<8x1xf32> -> vector<8x1xf32>
    %96 = vector.broadcast %95 : vector<8x1xf32> to vector<8x8xf32>
    %97 = arith.mulf %92, %96 : vector<8x8xf32>
    %98 = vector.extract_strided_slice %44 {offsets = [0, 16], sizes = [8, 8], strides = [1, 1]} : vector<8x32xf32> to vector<8x8xf32>
    %cst_33 = arith.constant dense<0.000000e+00> : vector<8x8xf32>
    %99 = tpu.matmul %97, %98, %cst_33 {dimension_numbers = #tpu.dot_dimension_numbers<[1], [0], [0], [1], [0, 0, 1, 1], [], []>} : vector<8x8xf32>, vector<8x8xf32>, vector<8x8xf32> -> vector<8x8xf32>
    %100 = vector.extract_strided_slice %46 {offsets = [16, 0], sizes = [8, 32], strides = [1, 1]} : vector<32x32xf32> to vector<8x32xf32>
    %cst_34 = arith.constant dense<0.000000e+00> : vector<8x32xf32>
    %101 = tpu.matmul %99, %100, %cst_34 {dimension_numbers = #tpu.dot_dimension_numbers<[1], [0], [0], [1], [0, 0, 1, 1], [], []>} : vector<8x8xf32>, vector<8x32xf32>, vector<8x32xf32> -> vector<8x32xf32>
    %102 = arith.addf %84, %101 : vector<8x32xf32>
    %103 = vector.extract_strided_slice %32 {offsets = [0, 24], sizes = [8, 8], strides = [1, 1]} : vector<8x32xf32> to vector<8x8xf32>
    %104 = vector.extract_strided_slice %38 {offsets = [0, 24], sizes = [8, 8], strides = [1, 1]} : vector<8x32xf32> to vector<8x8xf32>
    "tpu.trace_start"() <{level = 10 : i32, message = "ld,md->lm"}> : () -> ()
    %cst_35 = arith.constant dense<0.000000e+00> : vector<8x8xf32>
    %105 = tpu.matmul %103, %104, %cst_35 {dimension_numbers = #tpu.dot_dimension_numbers<[1], [1], [0], [0], [0, 0, 1, 0], [], []>} : vector<8x8xf32>, vector<8x8xf32>, vector<8x8xf32> -> vector<8x8xf32>
    "tpu.trace_stop"() : () -> ()
    %cst_36 = arith.constant dense<0xFF800000> : vector<8xf32>
    %106 = vector.multi_reduction <maximumf>, %105, %cst_36 [1] : vector<8x8xf32> to vector<8xf32>
    %107 = vector.shape_cast %106 : vector<8xf32> to vector<8x1xf32>
    %108 = vector.broadcast %107 : vector<8x1xf32> to vector<8x8xf32>
    %109 = arith.subf %105, %108 : vector<8x8xf32>
    %110 = math.exp %109 : vector<8x8xf32>
    %cst_37 = arith.constant dense<0.000000e+00> : vector<8xf32>
    %111 = vector.multi_reduction <add>, %110, %cst_37 [1] : vector<8x8xf32> to vector<8xf32>
    %112 = vector.shape_cast %111 : vector<8xf32> to vector<8x1xf32>
    %113 = tpu.reciprocal %112 {approx = true} : vector<8x1xf32> -> vector<8x1xf32>
    %114 = vector.broadcast %113 : vector<8x1xf32> to vector<8x8xf32>
    %115 = arith.mulf %110, %114 : vector<8x8xf32>
    %116 = vector.extract_strided_slice %44 {offsets = [0, 24], sizes = [8, 8], strides = [1, 1]} : vector<8x32xf32> to vector<8x8xf32>
    %cst_38 = arith.constant dense<0.000000e+00> : vector<8x8xf32>
    %117 = tpu.matmul %115, %116, %cst_38 {dimension_numbers = #tpu.dot_dimension_numbers<[1], [0], [0], [1], [0, 0, 1, 1], [], []>} : vector<8x8xf32>, vector<8x8xf32>, vector<8x8xf32> -> vector<8x8xf32>
    %118 = vector.extract_strided_slice %46 {offsets = [24, 0], sizes = [8, 32], strides = [1, 1]} : vector<32x32xf32> to vector<8x32xf32>
    %cst_39 = arith.constant dense<0.000000e+00> : vector<8x32xf32>
    %119 = tpu.matmul %117, %118, %cst_39 {dimension_numbers = #tpu.dot_dimension_numbers<[1], [0], [0], [1], [0, 0, 1, 1], [], []>} : vector<8x8xf32>, vector<8x32xf32>, vector<8x32xf32> -> vector<8x32xf32>
    %120 = arith.addf %102, %119 : vector<8x32xf32>
    %121 = arith.addf %1, %120 : vector<8x32xf32>
    %122 = vector.extract_strided_slice %2 {offsets = [2, 0], sizes = [1, 32], strides = [1, 1]} : vector<16x32xf32> to vector<1x32xf32>
    %123 = vector.extract_strided_slice %2 {offsets = [3, 0], sizes = [1, 32], strides = [1, 1]} : vector<16x32xf32> to vector<1x32xf32>
    %cst_40 = arith.constant dense<0.000000e+00> : vector<8xf32>
    %124 = vector.multi_reduction <add>, %121, %cst_40 [1] : vector<8x32xf32> to vector<8xf32>
    %125 = vector.shape_cast %124 : vector<8xf32> to vector<8x1xf32>
    %cst_41 = arith.constant 3.200000e+01 : f32
    %126 = vector.broadcast %cst_41 : f32 to vector<8x1xf32>
    %127 = arith.divf %125, %126 : vector<8x1xf32>
    %128 = vector.broadcast %127 : vector<8x1xf32> to vector<8x32xf32>
    %129 = arith.subf %121, %128 : vector<8x32xf32>
    %130 = arith.mulf %129, %129 : vector<8x32xf32>
    %cst_42 = arith.constant dense<0.000000e+00> : vector<8xf32>
    %131 = vector.multi_reduction <add>, %130, %cst_42 [1] : vector<8x32xf32> to vector<8xf32>
    %132 = vector.shape_cast %131 : vector<8xf32> to vector<8x1xf32>
    %cst_43 = arith.constant 3.200000e+01 : f32
    %133 = vector.broadcast %cst_43 : f32 to vector<8x1xf32>
    %134 = arith.divf %132, %133 : vector<8x1xf32>
    %135 = vector.broadcast %127 : vector<8x1xf32> to vector<8x32xf32>
    %136 = arith.subf %121, %135 : vector<8x32xf32>
    %cst_44 = arith.constant 9.99999974E-6 : f32
    %137 = vector.broadcast %cst_44 : f32 to vector<8x1xf32>
    %138 = arith.addf %134, %137 : vector<8x1xf32>
    %139 = math.rsqrt %138 : vector<8x1xf32>
    %140 = vector.broadcast %139 : vector<8x1xf32> to vector<8x32xf32>
    %141 = arith.mulf %136, %140 : vector<8x32xf32>
    %142 = vector.broadcast %122 : vector<1x32xf32> to vector<8x32xf32>
    %143 = arith.mulf %141, %142 : vector<8x32xf32>
    %144 = vector.broadcast %123 : vector<1x32xf32> to vector<8x32xf32>
    %145 = arith.addf %143, %144 : vector<8x32xf32>
    %c0_45 = arith.constant 0 : index
    %c0_46 = arith.constant 0 : index
    %146 = vector.load %arg4[%c0_45, %c0_46] : memref<40x128xf32, #tpu.memory_space<vmem>>, vector<32x128xf32>
    %cst_47 = arith.constant dense<0.000000e+00> : vector<8x128xf32>
    %147 = tpu.matmul %145, %146, %cst_47 {dimension_numbers = #tpu.dot_dimension_numbers<[1], [0], [0], [1], [0, 0, 1, 1], [], []>} : vector<8x32xf32>, vector<32x128xf32>, vector<8x128xf32> -> vector<8x128xf32>
    %c32 = arith.constant 32 : index
    %c0_48 = arith.constant 0 : index
    %148 = vector.load %arg4[%c32, %c0_48] : memref<40x128xf32, #tpu.memory_space<vmem>>, vector<1x128xf32>
    %149 = vector.broadcast %148 : vector<1x128xf32> to vector<8x128xf32>
    %150 = arith.addf %147, %149 : vector<8x128xf32>
    %cst_49 = arith.constant 1.702000e+00 : f32
    %151 = vector.broadcast %cst_49 : f32 to vector<8x128xf32>
    %152 = arith.mulf %151, %150 : vector<8x128xf32>
    %153 = arith.negf %152 : vector<8x128xf32>
    %154 = math.exp %153 : vector<8x128xf32>
    %cst_50 = arith.constant 1.000000e+00 : f32
    %155 = vector.broadcast %cst_50 : f32 to vector<8x128xf32>
    %156 = arith.addf %155, %154 : vector<8x128xf32>
    %157 = arith.divf %155, %156 : vector<8x128xf32>
    %158 = arith.mulf %150, %157 : vector<8x128xf32>
    %c0_51 = arith.constant 0 : index
    %c0_52 = arith.constant 0 : index
    %159 = vector.load %arg5[%c0_51, %c0_52] : memref<128x32xf32, #tpu.memory_space<vmem>>, vector<128x32xf32>
    %cst_53 = arith.constant dense<0.000000e+00> : vector<8x32xf32>
    %160 = tpu.matmul %158, %159, %cst_53 {dimension_numbers = #tpu.dot_dimension_numbers<[1], [0], [0], [1], [0, 0, 1, 1], [], []>} : vector<8x128xf32>, vector<128x32xf32>, vector<8x32xf32> -> vector<8x32xf32>
    %161 = vector.extract_strided_slice %2 {offsets = [7, 0], sizes = [1, 32], strides = [1, 1]} : vector<16x32xf32> to vector<1x32xf32>
    %162 = vector.broadcast %161 : vector<1x32xf32> to vector<8x32xf32>
    %163 = arith.addf %160, %162 : vector<8x32xf32>
    %164 = arith.addf %121, %163 : vector<8x32xf32>
    %165 = vector.extract_strided_slice %164 {offsets = [0, 0], sizes = [1, 32], strides = [1, 1]} : vector<8x32xf32> to vector<1x32xf32>
    %166 = vector.extract_strided_slice %2 {offsets = [4, 0], sizes = [1, 32], strides = [1, 1]} : vector<16x32xf32> to vector<1x32xf32>
    %167 = vector.extract_strided_slice %2 {offsets = [5, 0], sizes = [1, 32], strides = [1, 1]} : vector<16x32xf32> to vector<1x32xf32>
    %cst_54 = arith.constant dense<0.000000e+00> : vector<1xf32>
    %168 = vector.multi_reduction <add>, %165, %cst_54 [1] : vector<1x32xf32> to vector<1xf32>
    %169 = vector.shape_cast %168 : vector<1xf32> to vector<1x1xf32>
    %cst_55 = arith.constant 3.200000e+01 : f32
    %170 = vector.broadcast %cst_55 : f32 to vector<1x1xf32>
    %171 = arith.divf %169, %170 : vector<1x1xf32>
    %172 = vector.broadcast %171 : vector<1x1xf32> to vector<1x32xf32>
    %173 = arith.subf %165, %172 : vector<1x32xf32>
    %174 = arith.mulf %173, %173 : vector<1x32xf32>
    %cst_56 = arith.constant dense<0.000000e+00> : vector<1xf32>
    %175 = vector.multi_reduction <add>, %174, %cst_56 [1] : vector<1x32xf32> to vector<1xf32>
    %176 = vector.shape_cast %175 : vector<1xf32> to vector<1x1xf32>
    %cst_57 = arith.constant 3.200000e+01 : f32
    %177 = vector.broadcast %cst_57 : f32 to vector<1x1xf32>
    %178 = arith.divf %176, %177 : vector<1x1xf32>
    %179 = vector.broadcast %171 : vector<1x1xf32> to vector<1x32xf32>
    %180 = arith.subf %165, %179 : vector<1x32xf32>
    %cst_58 = arith.constant 9.99999974E-6 : f32
    %181 = vector.broadcast %cst_58 : f32 to vector<1x1xf32>
    %182 = arith.addf %178, %181 : vector<1x1xf32>
    %183 = math.rsqrt %182 : vector<1x1xf32>
    %184 = vector.broadcast %183 : vector<1x1xf32> to vector<1x32xf32>
    %185 = arith.mulf %180, %184 : vector<1x32xf32>
    %186 = arith.mulf %185, %166 : vector<1x32xf32>
    %187 = arith.addf %186, %167 : vector<1x32xf32>
    %c0_59 = arith.constant 0 : index
    %c0_60 = arith.constant 0 : index
    %188 = vector.load %arg6[%c0_59, %c0_60] : memref<32x16xf32, #tpu.memory_space<vmem>>, vector<32x16xf32>
    %cst_61 = arith.constant dense<0.000000e+00> : vector<1x16xf32>
    %189 = tpu.matmul %187, %188, %cst_61 {dimension_numbers = #tpu.dot_dimension_numbers<[1], [0], [0], [1], [0, 0, 1, 1], [], []>} : vector<1x32xf32>, vector<32x16xf32>, vector<1x16xf32> -> vector<1x16xf32>
    %190 = arith.mulf %189, %189 : vector<1x16xf32>
    %cst_62 = arith.constant dense<0.000000e+00> : vector<1xf32>
    %191 = vector.multi_reduction <add>, %190, %cst_62 [1] : vector<1x16xf32> to vector<1xf32>
    %192 = vector.shape_cast %191 : vector<1xf32> to vector<1x1xf32>
    %cst_63 = arith.constant 9.99999996E-13 : f32
    %193 = vector.broadcast %cst_63 : f32 to vector<1x1xf32>
    %194 = arith.addf %192, %193 : vector<1x1xf32>
    %195 = math.rsqrt %194 : vector<1x1xf32>
    %196 = vector.broadcast %195 : vector<1x1xf32> to vector<1x16xf32>
    %197 = arith.mulf %189, %196 : vector<1x16xf32>
    %c0_64 = arith.constant 0 : index
    %c0_65 = arith.constant 0 : index
    %c0_66 = arith.constant 0 : index
    %198 = vector.load %arg7[%c0_64, %c0_65, %c0_66] : memref<1x1x16xf32, #tpu.memory_space<vmem>>, vector<1x1x16xf32>
    %199 = vector.shape_cast %198 : vector<1x1x16xf32> to vector<1x16xf32>
    %200 = vector.shape_cast %197 : vector<1x16xf32> to vector<1x1x16xf32>
    tpu.vector_store %arg7[%c0_64, %c0_65, %c0_66], %200 {strides = array<i32>} : memref<1x1x16xf32, #tpu.memory_space<vmem>>, vector<1x1x16xf32>,
    return
  }
  func.func @transform_0(%arg0: i32) -> (i32, i32, i32) {
    %c0_i32 = arith.constant 0 : i32
    %c0_i32_0 = arith.constant 0 : i32
    %c0_i32_1 = arith.constant 0 : i32
    return %arg0, %c0_i32, %c0_i32_0 : i32, i32, i32
  }
  func.func @transform_1(%arg0: i32) -> (i32, i32) {
    %c0_i32 = arith.constant 0 : i32
    %c0_i32_0 = arith.constant 0 : i32
    %c0_i32_1 = arith.constant 0 : i32
    return %c0_i32, %c0_i32_0 : i32, i32
  }
  func.func @transform_2(%arg0: i32) -> (i32, i32, i32) {
    %c0_i32 = arith.constant 0 : i32
    %c0_i32_0 = arith.constant 0 : i32
    %c0_i32_1 = arith.constant 0 : i32
    %c0_i32_2 = arith.constant 0 : i32
    return %c0_i32, %c0_i32_0, %c0_i32_1 : i32, i32, i32
  }
  func.func @transform_3(%arg0: i32) -> (i32, i32) {
    %c0_i32 = arith.constant 0 : i32
    %c0_i32_0 = arith.constant 0 : i32
    %c0_i32_1 = arith.constant 0 : i32
    return %c0_i32, %c0_i32_0 : i32, i32
  }
  func.func @transform_4(%arg0: i32) -> (i32, i32) {
    %c0_i32 = arith.constant 0 : i32
    %c0_i32_0 = arith.constant 0 : i32
    %c0_i32_1 = arith.constant 0 : i32
    return %c0_i32, %c0_i32_0 : i32, i32
  }
  func.func @transform_5(%arg0: i32) -> (i32, i32) {
    %c0_i32 = arith.constant 0 : i32
    %c0_i32_0 = arith.constant 0 : i32
    %c0_i32_1 = arith.constant 0 : i32
    return %c0_i32, %c0_i32_0 : i32, i32
  }
  func.func @transform_6(%arg0: i32) -> (i32, i32, i32) {
    %c0_i32 = arith.constant 0 : i32
    %c0_i32_0 = arith.constant 0 : i32
    %c0_i32_1 = arith.constant 0 : i32
    return %arg0, %c0_i32, %c0_i32_0 : i32, i32, i32
  }
}

</mosaic_0001>

<bundles_post_ra>
// kernel: set_target_forward.1
= control target key start
LH: loop header
LB: loop body
LE: loop exit
PB: predicated region body
PF: predicated region fallthrough
CT: control target
= control target key end

     0   :  { %11 = vsyncpa [#allocation3], 0  ;;  %s2736_s0 = inlined_call_operand.vmem [shape: f32[2,8,32], index: 0, kind: input, shape index: {}]   ;;  %s2737_s1 = inlined_call_operand.vmem [shape: f32[16,32], index: 1, kind: input, shape index: {}]   ;;  %s2738_s2 = inlined_call_operand.vmem [shape: f32[4,32,32], index: 2, kind: input, shape index: {}]   ;;  %s2739_s3 = inlined_call_operand.vmem [shape: f32[40,128], index: 3, kind: input, shape index: {}]   ;;  %s2740_s4 = inlined_call_operand.vmem [shape: f32[128,32], index: 4, kind: input, shape index: {}]   ;;  %s2741_s5 = inlined_call_operand.vmem [shape: f32[32,16], index: 5, kind: input, shape index: {}]   ;;  %s2742_s6 = inlined_call_operand.hbm [shape: f32[2,1,16], index: 6, kind: output, shape index: {}]  }
   0x1   :  { %13 = vsyncpa [#allocation3 + $0x1], 0  ;;  %s2347_s21 = smov 0   ;;  %s2349_s22 = smov 0  }
   0x2   :  { %s2351_s23 = smov 0   ;;  %s2353_s24 = smov 0  }
   0x3 LB: > { %s2368_s25 = sadd.s32 4294967295, %s2303_s24   ;;  %s1855_s26 = sadd.s32 4294967294, %s2303_s24   ;;  %s2303_s24 = sphi %s2353_s24, %s2748_s24   ;;  %s2299_s23 = sphi %s2351_s23, %s2747_s23   ;;  %s2295_s22 = sphi %s2349_s22, %s2746_s22   ;;  %s2291_s21 = sphi %s2347_s21, %s2745_s21  }
   0x4   : > { %s2372_s27 = sadd.s32 1, %s2303_s24   ;;  %s157_s28 = sadd.s32 1, %s2299_s23 }
   0x5   : > { %s154_s29 = ssub.s32 %s2303_s24, %s2372_s27  ;;  %p167_p0 = scmp.ne.s32.totalorder %s2299_s23, %s2295_s22 }
   0x6   : > { %p155_p1 = scmp.eq.s32.totalorder %s154_s29, 0  ;;  %p168_p2 = scmp.eq.s32.totalorder %s2368_s25, 1 }
   0x7   : > { %p173_p3 = scmp.ne.s32.totalorder %s2295_s22, %s2291_s21  ;;  %p174_p4 = scmp.eq.s32.totalorder %s1855_s26, 1 }
   0x8   : > { %s2383_s30 = scalar_select %p155_p1, %s2299_s23, %s157_s28  }
   0x9   : > { %p2385_p5 = por %p168_p2, %p167_p0  ;;  %p2389_p6 = por %p174_p4, %p173_p3 }
   0xa   : > { %p1858_p7 = scmp.ge.s32.totalorder %s2303_s24, 1  ;;  %p214_p8 = scmp.lt.s32.totalorder %s2303_s24, 3 }
   0xc   : > { %p215_p9 = pnand %p1858_p7, %p214_p8 }
   0xd   : > { %p242_p10 = scmp.lt.s32.totalorder (!%p215_p9), %s2368_s25, 1  ;;  %vm249_vm0 = vcmask (!%p215_p9), 261120   ;;  %v274_v7 = vld [vmem:[%s2738_s2] sm:$0xff] (!%p215_p9)  ;;  %v275_v8 = vld [vmem:[%s2738_s2 + $0x8] sm:$0xff] (!%p215_p9)  ;;  %v276_v9 = vld [vmem:[%s2738_s2 + $0x10] sm:$0xff] (!%p215_p9)  ;;  %v2305_v10 = vmov (!%p215_p9), 0.0|0.0   ;;  %v264_v17 = vlaneseq (!%p215_p9) }
   0xe   : > { %218 = sbr.rel (%p215_p9) target bundleno = 4580 (0x11e4), region = 44  ;;  %2114 = vmatprep.subr.bf16.mxu0 (!%p215_p9), %v2305_v10  ;;  %v2115_v11 = vpack.c.bf16 (!%p215_p9), %v275_v8, %v274_v7  ;;  %v277_v12 = vld [vmem:[%s2738_s2 + $0x18] sm:$0xff] (!%p215_p9)  ;;  %vm2306_vm1 = vmmov (!%p215_p9), 0   ;;  %v2307_v13 = vmov (!%p215_p9), 0.0   ;;  %v2432_v21 = vld [vmem:[%s2737_s1] sm:$0xff] (!%p215_p9)  ;;  %v1862_v28 = vld [vmem:[%s2738_s2 + $0x28] sm:$0xff] (!%p215_p9) }
   0xf   : > { %1972 = vmatprep.mubr.msk.f32.mxu0 (!%p215_p9), %vm2306_vm1, %v2307_v13  ;;  %1997 = vmatprep.subr.mxu1 (!%p215_p9), %v2307_v13  ;;  %v2118_v14 = vpack.c.bf16 (!%p215_p9), %v277_v12, %v276_v9  ;;  %v2426_v19 = vshrl.u32 (!%p215_p9), %v264_v17, 7  ;;  %v1861_v27 = vld [vmem:[%s2738_s2 + $0x20] sm:$0xff] (!%p215_p9)  ;;  %v1863_v32 = vld [vmem:[%s2738_s2 + $0x30] sm:$0xff] (!%p215_p9)  ;;  %v1864_v33 = vld [vmem:[%s2738_s2 + $0x38] sm:$0xff] (!%p215_p9)  ;;  %vm518_vm2 = vcmask (!%p215_p9), 64512   ;;  %s2308_s12 = smov (!%p215_p9), 120  }
  0x10   : > { %1999 = vmatprep.mubr.msk.f32.mxu1 (!%p215_p9), %vm2306_vm1, %v2307_v13  ;;  %2116 = vmatpush3.bf16.msra.mxu0 (!%p215_p9), %v2115_v11  ;;  %v2121_v30 = vpack.c.bf16 (!%p215_p9), %v1862_v28, %v1861_v27  ;;  %v2124_v34 = vpack.c.bf16 (!%p215_p9), %v1864_v33, %v1863_v32  ;;  %v1866_v35 = vld [vmem:[%s2738_s2 + $0x40] sm:$0xff] (!%p215_p9)  ;;  %v1867_v36 = vld [vmem:[%s2738_s2 + $0x48] sm:$0xff] (!%p215_p9)  ;;  %v1868_v38 = vld [vmem:[%s2738_s2 + $0x50] sm:$0xff] (!%p215_p9)  ;;  %s2309_s15 = smov (!%p215_p9), 112   ;;  %s2310_s18 = smov (!%p215_p9), 104   ;;  %vm1680_vm3 = vcmask (!%p215_p9), 253952  }
  0x11   : > { %2117 = vmatprep.subr.bf16.mxu0 (!%p215_p9), %v2305_v10  ;;  %v266_v20 = vsub.s32 (!%p215_p9), 0, %v2426_v19  ;;  %v271_v22 = vsub.s32 (!%p215_p9), 1, %v2426_v19  ;;  %v2127_v37 = vpack.c.bf16 (!%p215_p9), %v1867_v36, %v1866_v35  ;;  %v1869_v39 = vld [vmem:[%s2738_s2 + $0x58] sm:$0xff] (!%p215_p9)  ;;  %v248_v41 = vld [vmem:[%s2737_s1 + $0x8] sm:$0xff] (!%p215_p9)  ;;  %v441_v50 = vsub.s32 (!%p215_p9), 2, %v2426_v19  ;;  %s1895_s14 = sshll.u32 (!%p215_p9), %s2368_s25, 4 }
  0x12   : > { %v2130_v40 = vpack.c.bf16 (!%p215_p9), %v1869_v39, %v1868_v38  ;;  %v1872_v28 = vld [vmem:[%s2738_s2 + $0x68] sm:$0xff] (!%p215_p9)  ;;  %v754_v39 = vsub.s32 (!%p215_p9), 6, %v2426_v19  ;;  %vm1779_vm4 = vcmask (!%p215_p9), 122880   ;;  %s2693_s19 = scalar_lea.hbm (!%p215_p9), %s2742_s6, %s1895_s14 }
  0x13   : > { %v267_v23 = vrot.slane (!%p215_p9), %v2432_v21, %v266_v20  ;;  %v272_v26 = vrot.slane (!%p215_p9), %v2432_v21, %v271_v22  ;;  %v281_v42 = vrot.slane (!%p215_p9), %v248_v41, %v266_v20  ;;  %v363_v46 = vrot.slane (!%p215_p9), %v248_v41, %v271_v22 }
  0x14   : > { %2119 = vmatpush3.bf16.msra.mxu0 (!%p215_p9), %v2118_v14  ;;  %v442_v51 = vrot.slane (!%p215_p9), %v248_v41, %v441_v50 }
  0x15   : > { %s243_s9 = scalar_select %p242_p10, %s2368_s25, 1  ;;  %2120 = vmatprep.subr.bf16.mxu0 %v2305_v10 }
  0x16   : > { %s2311_s25 = smov [#allocation2]  }
  0x17   : > { %s1859_s10 = sshll.u32 %s243_s9, 3  ;;  %s2245_s28 = sshll.u32 %s2311_s25, 4  ;;  %s2246_s28 = int_to_ptr.vmem [resolvable:$false] %s2245_s28 }
  0x18   : > { %s245_s13 = scalar_lea.vmem %s2736_s0, %s1859_s10  ;;  %s2247_s29 = scalar_lea.vmem %s2246_s28, 32 }
  0x19   : > { %v2400_v0 = vld [vmem:[%s245_s13] sm:$0xff]  ;;  %s240_s13 = sand.u32 1, %s2295_s22  }
  0x1a   : > { %v250_v1 = vsel %vm249_vm0, %v2400_v0, 0.0  ;;  %s1788_s20 = scalar_lea.sflag [#allocation3], %s240_s13 }
  0x1b   : > { %251 = vadd.xlane.f32.xlu0 %v250_v1 }
  0xa8   : > { %v252_v2 = vpop.xlane.xlu0 %251 }
  0xa9   : > { %v254_v3 = vmul.f32 0.03125, %v252_v2 }
  0xab   : > { %v255_v4 = vsub.f32 %v2400_v0, %v254_v3 }
  0xad   : > { %v256_v5 = vmul.f32 %v255_v4, %v255_v4 }
  0xaf   : > { %v257_v6 = vsel %vm249_vm0, %v256_v5, 0.0  ;;  %v1871_v5 = vld [vmem:[%s2738_s2 + $0x60] sm:$0xff] }
  0xb0   : > { %258 = vadd.xlane.f32.xlu0 %v257_v6 }
 0x13d   : > { %v259_v15 = vpop.xlane.xlu0 %258 }
 0x13e   : > { %v260_v16 = vmul.f32 0.03125, %v259_v15 }
 0x140   : > { %v261_v18 = vadd.f32 1e-05, %v260_v16 }
 0x142   : > { %2213 = vrsqrt.f32 %v261_v18 }
 0x14c   : > { %v2214_v24 = vpop.eup %2213 }
 0x14d   : > { %v263_v25 = vmul.f32 %v2214_v24, %v255_v4 }
 0x14f   : > { %v268_v29 = vmul.f32 %v267_v23, %v263_v25 }
 0x151   : > { %v273_v31 = vadd.f32 %v272_v26, %v268_v29 }
 0x153   : > { %1973 = vmatmul.mubr.msk.f32.vlgmr.msra.gmra.mrb[0].mxu0 %vm249_vm0, %v273_v31 }
 0x154   : > { %2122 = vmatpush3.bf16.msra.mxu0 %v2121_v30  ;;  %1983 = vmatprep.mubr.msk.f32.mxu0 %vm2306_vm1, %v2307_v13 }
 0x155   : > { %2123 = vmatprep.subr.bf16.mxu0 %v2305_v10 }
 0x158   : > { %2125 = vmatpush3.bf16.msra.mxu0 %v2124_v34 }
 0x159   : > { %2126 = vmatprep.subr.bf16.mxu0 %v2305_v10 }
 0x15b   : > { %1984 = vmatmul.mubr.msk.f32.vlgmr.msra.gmra.mrb[2].mxu0 %vm249_vm0, %v273_v31 }
 0x15c   : > { %2128 = vmatpush3.bf16.msra.mxu0 %v2127_v37  ;;  %1994 = vmatprep.mubr.msk.f32.mxu0 %vm2306_vm1, %v2307_v13 }
 0x15d   : > { %2129 = vmatprep.subr.bf16.mxu0 %v2305_v10 }
 0x160   : > { %2131 = vmatpush3.bf16.msra.mxu0 %v2130_v40  ;;  %v755_v40 = vrot.slane %v2432_v21, %v754_v39  ;;  %v1589_v39 = vld [vmem:[%s2740_s4] sm:$0xff] }
 0x161   : > { %2007 = vmatprep.subr.mxu0 %v2307_v13 }
 0x163   : > { %1995 = vmatmul.mubr.msk.f32.vlgmr.msra.gmra.mrb[4].mxu0 %vm249_vm0, %v273_v31 }
 0x164   : > { %2009 = vmatprep.mubr.msk.f32.mxu0 %vm2306_vm1, %v2307_v13  ;;  %2008 = vmatpush3.msra.mxu0 %v1871_v5 }
 0x165   : > { %2017 = vmatprep.subr.mxu0 %v2307_v13 }
 0x226   : > { %v351_v43 = vpop.f32.mrb[0].mxu0 }
 0x227   : > { %v2477_v44 = vadd.f32 %v351_v43, %v281_v42  ;;  %v1974_v45 = vpop.f32.mrb[1].mxu0 }
 0x22e   : > { %v430_v47 = vpop.f32.mrb[2].mxu0 }
 0x22f   : > { %v2479_v48 = vadd.f32 %v430_v47, %v363_v46  ;;  %v1985_v49 = vpop.f32.mrb[3].mxu0 }
 0x231   : > { %759 = vrot.lane.b32.xlu0 %v2479_v48, %s2308_s12  ;;  %1998 = vmatpush3.xpose.msk.msra.mxu1 %vm518_vm2, %v2479_v48 }
 0x232   : > { %2002 = vmatprep.subr.mxu1 %v2307_v13 }
 0x234   : > { %2000 = vmatmul.mubr.msk.f32.vlgmr.msra.gmra.mrb[0].mxu1 %vm518_vm2, %v2477_v44 }
 0x235   : > { %2004 = vmatprep.mubr.msk.f32.mxu1 %vm2306_vm1, %v2307_v13 }
 0x236   : > { %v509_v52 = vpop.f32.mrb[4].mxu0 }
 0x237   : > { %v2493_v53 = vadd.f32 %v509_v52, %v442_v51  ;;  %v1996_v54 = vpop.f32.mrb[5].mxu0  ;;  %v1873_v52 = vld [vmem:[%s2738_s2 + $0x70] sm:$0xff] }
 0x239   : > { %2003 = vmatpush3.msra.mxu1 %v2493_v53 }
 0x23a   : > { %2012 = vmatprep.subr.mxu1 %v2307_v13 }
 0x2a3   : > { %v760_v3 = vpop.permute.xlu0 %759 }
 0x307   : > { %v591_v55 = vpop.f32.mrb[0].mxu1 }
 0x308   : > { %v2001_v56 = vpop.f32.mrb[1].mxu1  ;;  %v595_v57 = vsel %vm518_vm2, %v591_v55, -inf }
 0x309   : > { %596 = vmax.xlane.f32.xlu1 %v595_v57 }
 0x396   : > { %v597_v58 = vpop.xlane.xlu1 %596 }
 0x397   : > { %v598_v59 = vsub.f32 %v591_v55, %v597_v58 }
 0x399   : > { %v599_v60 = vmul.f32 1.442695, %v598_v59 }
 0x39b   : > { %2215 = vpow2.f32 %v599_v60 }
 0x3a5   : > { %v2216_v61 = vpop.eup %2215 }
 0x3a6   : > { %v601_v62 = vsel %vm518_vm2, %v2216_v61, 0.0 }
 0x3a7   : > { %602 = vadd.xlane.f32.xlu1 %v601_v62 }
 0x3b8   : > { %757 = vrot.lane.b32.xlu1 %v2477_v44, %s2308_s12 }
 0x434   : > { %v603_v63 = vpop.xlane.xlu1 %602 }
 0x435   : > { %2217 = vrcp.f32 %v603_v63 }
 0x438   : > { %v758_v4 = vpop.permute.xlu1 %757 }
 0x43f   : > { %v2218_v1 = vpop.eup %2217 }
 0x440   : > { %v605_v2 = vmul.f32 %v2218_v1, %v2216_v61 }
 0x442   : > { %2005 = vmatmul.mubr.msk.f32.vlgmr.msra.gmra.mrb[2].mxu1 %vm518_vm2, %v605_v2  ;;  %v1874_v2 = vld [vmem:[%s2738_s2 + $0x78] sm:$0xff] }
 0x443   : > { %2013 = vmatpush3.xpose.msk.msra.mxu1 %vm518_vm2, %v760_v3  ;;  %2014 = vmatprep.mubr.msk.f32.mxu1 %vm2306_vm1, %v2307_v13 }
 0x444   : > { %2022 = vmatprep.subr.mxu1 %v2307_v13 }
 0x446   : > { %2015 = vmatmul.mubr.msk.f32.vlgmr.msra.gmra.mrb[4].mxu1 %vm518_vm2, %v758_v4 }
 0x447   : > { %2024 = vmatprep.mubr.msk.f32.mxu1 %vm2306_vm1, %v2307_v13  ;;  %2023 = vmatpush3.msra.mxu1 %v1872_v28 }
 0x448   : > { %2032 = vmatprep.subr.mxu1 %v2307_v13 }
 0x515   : > { %v675_v6 = vpop.f32.mrb[2].mxu1 }
 0x516   : > { %v2006_v7 = vpop.f32.mrb[3].mxu1  ;;  %2010 = vmatmul.mubr.msk.f32.vlgmr.msra.gmra.mrb[6].mxu0 %vm518_vm2, %v675_v6 }
 0x517   : > { %2019 = vmatprep.mubr.msk.f32.mxu0 %vm2306_vm1, %v2307_v13 }
 0x519   : > { %v831_v8 = vpop.f32.mrb[4].mxu1 }
 0x51a   : > { %v2016_v9 = vpop.f32.mrb[5].mxu1  ;;  %v835_v11 = vsel %vm518_vm2, %v831_v8, -inf }
 0x51b   : > { %836 = vmax.xlane.f32.xlu1 %v835_v11 }
 0x52c   : > { %999 = vrot.lane.b32.xlu1 %v2479_v48, %s2309_s15 }
 0x530   : > { %997 = vrot.lane.b32.xlu1 %v2477_v44, %s2309_s15 }
 0x5a8   : > { %v837_v12 = vpop.xlane.xlu1 %836 }
 0x5a9   : > { %v838_v14 = vsub.f32 %v831_v8, %v837_v12 }
 0x5ab   : > { %v839_v15 = vmul.f32 1.442695, %v838_v14 }
 0x5ac   : > { %v1000_v25 = vpop.permute.xlu1 %999 }
 0x5ad   : > { %2219 = vpow2.f32 %v839_v15 }
 0x5b0   : > { %v998_v27 = vpop.permute.xlu1 %997 }
 0x5b7   : > { %v2220_v16 = vpop.eup %2219 }
 0x5b8   : > { %v841_v17 = vsel %vm518_vm2, %v2220_v16, 0.0 }
 0x5b9   : > { %842 = vadd.xlane.f32.xlu0 %v841_v17 }
 0x5cf   : > { %847 = vrot.lane.b32.xlu0 %v2493_v53, %s2308_s12 }
 0x5e9   : > { %v748_v18 = vpop.f32.mrb[6].mxu0 }
 0x5ea   : > { %v2011_v20 = vpop.f32.mrb[7].mxu0  ;;  %v756_v41 = vadd.f32 %v755_v40, %v748_v18  ;;  %v1590_v40 = vld [vmem:[%s2740_s4 + $0x8] sm:$0xff] }
 0x646   : > { %v843_v22 = vpop.xlane.xlu0 %842 }
 0x647   : > { %2221 = vrcp.f32 %v843_v22 }
 0x64a   : > { %v848_v23 = vpop.permute.xlu0 %847 }
 0x64b   : > { %2018 = vmatpush3.msra.mxu0 %v848_v23 }
 0x64c   : > { %2027 = vmatprep.subr.mxu0 %v2307_v13 }
 0x651   : > { %v2222_v24 = vpop.eup %2221 }
 0x652   : > { %v845_v26 = vmul.f32 %v2222_v24, %v2220_v16  ;;  %v1499_v24 = vld [vmem:[%s2739_s3] sm:$0xff] }
 0x654   : > { %2020 = vmatmul.mubr.msk.f32.vlgmr.msra.gmra.mrb[8].mxu0 %vm518_vm2, %v845_v26  ;;  %v1501_v26 = vld [vmem:[%s2739_s3 + $0x10] sm:$0xff] }
 0x655   : > { %2028 = vmatpush3.xpose.msk.msra.mxu0 %vm518_vm2, %v1000_v25  ;;  %2029 = vmatprep.mubr.msk.f32.mxu0 %vm2306_vm1, %v2307_v13 }
 0x656   : > { %2037 = vmatprep.subr.mxu0 %v2307_v13 }
 0x658   : > { %2030 = vmatmul.mubr.msk.f32.vlgmr.msra.gmra.mrb[10].mxu0 %vm518_vm2, %v998_v27  ;;  %v1502_v27 = vld [vmem:[%s2739_s3 + $0x18] sm:$0xff] }
 0x659   : > { %2039 = vmatprep.mubr.msk.f32.mxu0 %vm2306_vm1, %v2307_v13  ;;  %2038 = vmatpush3.msra.mxu0 %v1873_v52  ;;  %v2136_v28 = vpack.c.bf16 %v1502_v27, %v1501_v26  ;;  %v1704_v27 = vld [vmem:[%s2741_s5 + $0x18] sm:$0xff] }
 0x65a   : > { %2047 = vmatprep.subr.mxu0 %v2307_v13 }
 0x727   : > { %v919_v29 = vpop.f32.mrb[8].mxu0 }
 0x728   : > { %v2021_v30 = vpop.f32.mrb[9].mxu0  ;;  %2025 = vmatmul.mubr.msk.f32.vlgmr.msra.gmra.mrb[6].mxu1 %vm518_vm2, %v919_v29 }
 0x729   : > { %2034 = vmatprep.mubr.msk.f32.mxu1 %vm2306_vm1, %v2307_v13 }
 0x72b   : > { %v1071_v31 = vpop.f32.mrb[10].mxu0 }
 0x72c   : > { %v2031_v32 = vpop.f32.mrb[11].mxu0  ;;  %v1075_v33 = vsel %vm518_vm2, %v1071_v31, -inf }
 0x72d   : > { %1076 = vmax.xlane.f32.xlu1 %v1075_v33  ;;  %v1496_v32 = vsub.s32 3, %v2426_v19  ;;  %v1492_v33 = vrot.slane %v2432_v21, %v441_v50  ;;  %v2139_v50 = vpack.c.bf16 %v1590_v40, %v1589_v39 }
 0x73e   : > { %1238 = vrot.lane.b32.xlu1 %v2479_v48, %s2310_s18 }
 0x742   : > { %1236 = vrot.lane.b32.xlu1 %v2477_v44, %s2310_s18 }
 0x7ba   : > { %v1077_v34 = vpop.xlane.xlu1 %1076 }
 0x7bb   : > { %v1078_v35 = vsub.f32 %v1071_v31, %v1077_v34 }
 0x7bd   : > { %v1079_v36 = vmul.f32 1.442695, %v1078_v35 }
 0x7be   : > { %v1239_v48 = vpop.permute.xlu1 %1238 }
 0x7bf   : > { %2223 = vpow2.f32 %v1079_v36  ;;  %v1497_v36 = vrot.slane %v2432_v21, %v1496_v32  ;;  %v1695_v32 = vrot.slane %v2432_v21, 4 }
 0x7c2   : > { %v1237_v51 = vpop.permute.xlu1 %1236 }
 0x7c9   : > { %v2224_v37 = vpop.eup %2223 }
 0x7ca   : > { %v1081_v38 = vsel %vm518_vm2, %v2224_v37, 0.0 }
 0x7cb   : > { %1082 = vadd.xlane.f32.xlu0 %v1081_v38 }
 0x7e1   : > { %1086 = vrot.lane.b32.xlu0 %v2493_v53, %s2309_s15  ;;  %s241_s15 = scalar_lea.vmem [#allocation2], %s240_s13 }
 0x7e2   : > { %s1800_s16 = sshll.u32 %s241_s15, 4  ;;  %s2695_s16 = int_to_ptr.vmem [resolvable:$true] %s1800_s16 }
 0x7e3   : > { %s2241_s26 = scalar_lea.vmem %s2695_s16, 16  ;;  %p2248_p0 = scmp.lt.s32.totalorder %s2695_s16, %s2246_s28 }
 0x7e4   : > { %p2242_p11 = scmp.ne.s32.totalorder %s2695_s16, %s2241_s26  ;;  %p2249_p1 = scmp.lt.s32.totalorder %s2247_s29, %s2241_s26 }
 0x7e6   : > { %p2243_p12 = pnand %p2242_p11, %p2385_p5  ;;  %p2250_p2 = por %p2249_p1, %p2248_p0 }
 0x7e8   : > { %p2244_p13 = pneg %p2243_p12 }
 0x7ea   : > { %p2251_p3 = pnand %p2250_p2, %p2244_p13 }
 0x7fb   : > { %v992_v42 = vpop.f32.mrb[6].mxu1 }
 0x7fc   : > { %v996_v43 = vadd.f32 %v992_v42, %v756_v41  ;;  %v2026_v45 = vpop.f32.mrb[7].mxu1  ;;  %v1591_v41 = vld [vmem:[%s2740_s4 + $0x10] sm:$0xff] }
 0x7fd   : > { %v1594_v45 = vld [vmem:[%s2740_s4 + $0x28] sm:$0xff] }
 0x858   : > { %v1083_v44 = vpop.xlane.xlu0 %1082 }
 0x859   : > { %2225 = vrcp.f32 %v1083_v44 }
 0x85c   : > { %v1087_v46 = vpop.permute.xlu0 %1086 }
 0x85d   : > { %2033 = vmatpush3.msra.mxu1 %v1087_v46  ;;  %v1595_v46 = vld [vmem:[%s2740_s4 + $0x30] sm:$0xff] }
 0x85e   : > { %2042 = vmatprep.subr.mxu1 %v2307_v13 }
 0x863   : > { %v2226_v47 = vpop.eup %2225 }
 0x864   : > { %v1085_v49 = vmul.f32 %v2226_v47, %v2224_v37  ;;  %v1596_v47 = vld [vmem:[%s2740_s4 + $0x38] sm:$0xff] }
 0x866   : > { %2035 = vmatmul.mubr.msk.f32.vlgmr.msra.gmra.mrb[8].mxu1 %vm518_vm2, %v1085_v49  ;;  %v1597_v49 = vld [vmem:[%s2740_s4 + $0x40] sm:$0xff] }
 0x867   : > { %2043 = vmatpush3.xpose.msk.msra.mxu1 %vm518_vm2, %v1239_v48  ;;  %2044 = vmatprep.mubr.msk.f32.mxu1 %vm2306_vm1, %v2307_v13  ;;  %v2148_v48 = vpack.c.bf16 %v1596_v47, %v1595_v46 }
 0x868   : > { %2052 = vmatprep.subr.mxu1 %v2307_v13 }
 0x86a   : > { %2045 = vmatmul.mubr.msk.f32.vlgmr.msra.gmra.mrb[10].mxu1 %vm518_vm2, %v1237_v51  ;;  %v1598_v51 = vld [vmem:[%s2740_s4 + $0x48] sm:$0xff] }
 0x86b   : > { %2054 = vmatprep.mubr.msk.f32.mxu1 %vm2306_vm1, %v2307_v13  ;;  %2053 = vmatpush3.msra.mxu1 %v1874_v2  ;;  %v2151_v52 = vpack.c.bf16 %v1598_v51, %v1597_v49 }
 0x86c   : > { %2138 = vmatprep.subr.bf16.mxu1 %v2305_v10 }
 0x939   : > { %v1158_v54 = vpop.f32.mrb[8].mxu1 }
 0x93a   : > { %v2036_v55 = vpop.f32.mrb[9].mxu1  ;;  %2040 = vmatmul.mubr.msk.f32.vlgmr.msra.gmra.mrb[12].mxu0 %vm518_vm2, %v1158_v54  ;;  %v1599_v54 = vld [vmem:[%s2740_s4 + $0x50] sm:$0xff] }
 0x93b   : > { %2049 = vmatprep.mubr.msk.f32.mxu0 %vm2306_vm1, %v2307_v13  ;;  %v1600_v55 = vld [vmem:[%s2740_s4 + $0x58] sm:$0xff] }
 0x93d   : > { %v1310_v56 = vpop.f32.mrb[10].mxu1 }
 0x93e   : > { %v2046_v57 = vpop.f32.mrb[11].mxu1  ;;  %v1314_v58 = vsel %vm518_vm2, %v1310_v56, -inf }
 0x93f   : > { %1315 = vmax.xlane.f32.xlu0 %v1314_v58  ;;  %v1601_v57 = vld [vmem:[%s2740_s4 + $0x60] sm:$0xff]  ;;  %v1602_v58 = vld [vmem:[%s2740_s4 + $0x68] sm:$0xff] }
 0x955   : > { %1325 = vrot.lane.b32.xlu0 %v2493_v53, %s2310_s18 }
 0x9cc   : > { %v1316_v59 = vpop.xlane.xlu0 %1315 }
 0x9cd   : > { %v1317_v60 = vsub.f32 %v1310_v56, %v1316_v59  ;;  %v2154_v56 = vpack.c.bf16 %v1600_v55, %v1599_v54  ;;  %v2157_v59 = vpack.c.bf16 %v1602_v58, %v1601_v57 }
 0x9cf   : > { %v1318_v61 = vmul.f32 1.442695, %v1317_v60  ;;  %v1603_v60 = vld [vmem:[%s2740_s4 + $0x70] sm:$0xff] }
 0x9d0   : > { %v1326_v62 = vpop.permute.xlu0 %1325 }
 0x9d1   : > { %2227 = vpow2.f32 %v1318_v61  ;;  %2048 = vmatpush3.msra.mxu0 %v1326_v62  ;;  %v1604_v61 = vld [vmem:[%s2740_s4 + $0x78] sm:$0xff] }
 0x9d2   : > { %2132 = vmatprep.subr.bf16.mxu0 %v2305_v10  ;;  %v2160_v62 = vpack.c.bf16 %v1604_v61, %v1603_v60 }
 0x9db   : > { %v2228_v63 = vpop.eup %2227 }
 0x9dc   : > { %v1320_v1 = vsel %vm518_vm2, %v2228_v63, 0.0 }
 0x9dd   : > { %1321 = vadd.xlane.f32.xlu1 %v1320_v1 }
 0xa0d   : > { %v1231_v53 = vpop.f32.mrb[12].mxu0 }
 0xa0e   : > { %v1235_v3 = vadd.f32 %v1231_v53, %v996_v43  ;;  %v2041_v4 = vpop.f32.mrb[13].mxu0  ;;  %v1593_v43 = vld [vmem:[%s2740_s4 + $0x20] sm:$0xff] }
 0xa0f   : > { %v2145_v44 = vpack.c.bf16 %v1594_v45, %v1593_v43 }
 0xa6a   : > { %v1322_v5 = vpop.xlane.xlu1 %1321 }
 0xa6b   : > { %2229 = vrcp.f32 %v1322_v5 }
 0xa75   : > { %v2230_v6 = vpop.eup %2229 }
 0xa76   : > { %v1324_v7 = vmul.f32 %v2230_v6, %v2228_v63  ;;  %v1891_v63 = vld [vmem:[%s2739_s3 + $0x20] ss:$0 sm:$0xff] }
 0xa78   : > { %2050 = vmatmul.mubr.msk.f32.vlgmr.msra.gmra.mrb[14].mxu0 %vm518_vm2, %v1324_v7 }
 0xa79   : > { %2065 = vmatprep.mubr.msk.f32.mxu0 %vm2306_vm1, %v2307_v13 }
 0xb4b   : > { %v1397_v8 = vpop.f32.mrb[14].mxu0 }
 0xb4c   : > { %v2051_v9 = vpop.f32.mrb[15].mxu0  ;;  %2055 = vmatmul.mubr.msk.f32.vlgmr.msra.gmra.mrb[12].mxu1 %vm518_vm2, %v1397_v8 }
 0xb4d   : > { %2100 = vmatprep.mubr.msk.f32.mxu1 %vm2306_vm1, %v2307_v13  ;;  %2140 = vmatpush3.bf16.msra.mxu1 %v2139_v50  ;;  %v1607_v9 = vsub.s32 7, %v2426_v19  ;;  %v1701_v19 = vld [vmem:[%s2741_s5] sm:$0xff] }
 0xb4e   : > { %2141 = vmatprep.subr.bf16.mxu1 %v2305_v10 }
 0xc1f   : > { %v1470_v11 = vpop.f32.mrb[12].mxu1 }
 0xc20   : > { %v1474_v12 = vadd.f32 %v1470_v11, %v1235_v3  ;;  %v2056_v14 = vpop.f32.mrb[13].mxu1  ;;  %v1608_v11 = vrot.slane %v2432_v21, %v1607_v9 }
 0xc22   : > { %v2582_v15 = vadd.f32 %v1474_v12, %v2400_v0  ;;  %v1500_v0 = vld [vmem:[%s2739_s3 + $0x8] sm:$0xff] }
 0xc23   : > { %v2133_v25 = vpack.c.bf16 %v1500_v0, %v1499_v24 }
 0xc24   : > { %v1476_v16 = vsel %vm249_vm0, %v2582_v15, 0.0 }
 0xc25   : > { %1477 = vadd.xlane.f32.xlu1 %v1476_v16  ;;  %2134 = vmatpush3.bf16.msra.mxu0 %v2133_v25  ;;  %v1702_v25 = vld [vmem:[%s2741_s5 + $0x8] sm:$0xff] }
 0xc26   : > { %2135 = vmatprep.subr.bf16.mxu0 %v2305_v10  ;;  %v2163_v26 = vpack.c.bf16 %v1702_v25, %v1701_v19 }
 0xc29   : > { %2137 = vmatpush3.bf16.msra.mxu0 %v2136_v28 }
 0xc2a   : > { %2162 = vmatprep.subr.bf16.mxu0 %v2305_v10 }
 0xcb2   : > { %v1478_v17 = vpop.xlane.xlu1 %1477 }
 0xcb3   : > { %v1479_v18 = vmul.f32 0.03125, %v1478_v17 }
 0xcb5   : > { %v1480_v20 = vsub.f32 %v2582_v15, %v1479_v18 }
 0xcb7   : > { %v1481_v22 = vmul.f32 %v1480_v20, %v1480_v20 }
 0xcb9   : > { %v1482_v23 = vsel %vm249_vm0, %v1481_v22, 0.0 }
 0xcba   : > { %1483 = vadd.xlane.f32.xlu1 %v1482_v23 }
 0xd47   : > { %v1484_v29 = vpop.xlane.xlu1 %1483 }
 0xd48   : > { %v1485_v30 = vmul.f32 0.03125, %v1484_v29 }
 0xd4a   : > { %v1486_v31 = vadd.f32 1e-05, %v1485_v30 }
 0xd4c   : > { %2231 = vrsqrt.f32 %v1486_v31 }
 0xd56   : > { %v2232_v34 = vpop.eup %2231 }
 0xd57   : > { %v1488_v35 = vmul.f32 %v2232_v34, %v1480_v20  ;;  %v1698_v34 = vrot.slane %v2432_v21, 5 }
 0xd59   : > { %v1493_v37 = vmul.f32 %v1492_v33, %v1488_v35 }
 0xd5b   : > { %v1498_v38 = vadd.f32 %v1497_v36, %v1493_v37 }
 0xd5d   : > { %2066 = vmatmul.mubr.msk.f32.vlgmr.msra.gmra.mrb[16].mxu0 %vm249_vm0, %v1498_v38 }
 0xd5e   : > { %2111 = vmatprep.mubr.msk.f32.mxu0 %vm2306_vm1, %v2307_v13  ;;  %v1592_v13 = vld [vmem:[%s2740_s4 + $0x18] sm:$0xff]  ;;  %2164 = vmatpush3.bf16.msra.mxu0 %v2163_v26 }
 0xd5f   : > { %v2142_v42 = vpack.c.bf16 %v1592_v13, %v1591_v41  ;;  %2165 = vmatprep.subr.bf16.mxu0 %v2305_v10 }
 0xd61   : > { %2143 = vmatpush3.bf16.msra.mxu1 %v2142_v42 }
 0xd62   : > { %2144 = vmatprep.subr.bf16.mxu1 %v2305_v10 }
 0xd65   : > { %2146 = vmatpush3.bf16.msra.mxu1 %v2145_v44 }
 0xd66   : > { %2147 = vmatprep.subr.bf16.mxu1 %v2305_v10 }
 0xd69   : > { %2149 = vmatpush3.bf16.msra.mxu1 %v2148_v48 }
 0xd6a   : > { %2150 = vmatprep.subr.bf16.mxu1 %v2305_v10 }
 0xd6d   : > { %2152 = vmatpush3.bf16.msra.mxu1 %v2151_v52 }
 0xd6e   : > { %2153 = vmatprep.subr.bf16.mxu1 %v2305_v10 }
 0xd71   : > { %2155 = vmatpush3.bf16.msra.mxu1 %v2154_v56 }
 0xd72   : > { %2156 = vmatprep.subr.bf16.mxu1 %v2305_v10 }
 0xd75   : > { %2158 = vmatpush3.bf16.msra.mxu1 %v2157_v59 }
 0xd76   : > { %2159 = vmatprep.subr.bf16.mxu1 %v2305_v10 }
 0xd79   : > { %2161 = vmatpush3.bf16.msra.mxu1 %v2160_v62 }
 0xe30   : > { %v1577_v1 = vpop.f32.mrb[16].mxu0 }
 0xe31   : > { %v1578_v2 = vadd.f32 %v1891_v63, %v1577_v1  ;;  %v2067_v53 = vpop.f32.mrb[17].mxu0 }
 0xe33   : > { %v1893_v3 = vmul.f32 -1.702, %v1578_v2 }
 0xe35   : > { %v1583_v4 = vmul.f32 1.442695, %v1893_v3 }
 0xe37   : > { %2233 = vpow2.f32 %v1583_v4 }
 0xe41   : > { %v2234_v5 = vpop.eup %2233 }
 0xe42   : > { %v1585_v6 = vadd.f32 1.0, %v2234_v5 }
 0xe44   : > { %2235 = vrcp.f32 %v1585_v6 }
 0xe4e   : > { %v2236_v7 = vpop.eup %2235 }
 0xe4f   : > { %v1588_v8 = vmul.f32 %v2236_v7, %v1578_v2 }
 0xe51   : > { %2101 = vmatmul.mubr.f32.vlgmr.msra.gmra.mrb[14].mxu1 %v1588_v8 }
 0xf24   : > { %v1675_v12 = vpop.f32.mrb[14].mxu1 }
 0xf25   : > { %v1676_v14 = vadd.f32 %v1675_v12, %v1608_v11  ;;  %v2102_v16 = vpop.f32.mrb[15].mxu1 }
 0xf27   : > { %v1679_v17 = vadd.f32 %v1676_v14, %v2582_v15  ;;  %v1703_v15 = vld [vmem:[%s2741_s5 + $0x10] sm:$0xff] }
 0xf28   : > { %v2166_v28 = vpack.c.bf16 %v1704_v27, %v1703_v15 }
 0xf29   : > { %v1681_v18 = vsel %vm1680_vm3, %v1679_v17, 0.0 }
 0xf2a   : > { %1682 = vadd.xlane.f32.xlu1 %v1681_v18  ;;  %2167 = vmatpush3.bf16.msra.mxu0 %v2166_v28 }
 0xfb7   : > { %v1683_v20 = vpop.xlane.xlu1 %1682 }
 0xfb8   : > { %v1684_v22 = vmul.f32 0.03125, %v1683_v20 }
 0xfba   : > { %v1685_v23 = vsub.f32 %v1679_v17, %v1684_v22 }
 0xfbc   : > { %v1686_v24 = vmul.f32 %v1685_v23, %v1685_v23 }
 0xfbe   : > { %v1687_v0 = vsel %vm1680_vm3, %v1686_v24, 0.0 }
 0xfbf   : > { %1688 = vadd.xlane.f32.xlu1 %v1687_v0 }
0x104c   : > { %v1689_v29 = vpop.xlane.xlu1 %1688 }
0x104d   : > { %v1690_v30 = vmul.f32 0.03125, %v1689_v29 }
0x104f   : > { %v1691_v31 = vadd.f32 1e-05, %v1690_v30 }
0x1051   : > { %2237 = vrsqrt.f32 %v1691_v31 }
0x105b   : > { %v2238_v33 = vpop.eup %2237 }
0x105c   : > { %v1693_v10 = vmul.f32 %v2238_v33, %v1685_v23 }
0x105e   : > { %v1697_v35 = vmul.f32 %v1695_v32, %v1693_v10 }
0x1060   : > { %v1700_v36 = vadd.f32 %v1698_v34, %v1697_v35 }
0x1062   : > { %2112 = vmatmul.mubr.msk.f32.vlgmr.msra.gmra.mrb[18].mxu0 %vm249_vm0, %v1700_v36 }
0x1135   : > { %v1774_v37 = vpop.f32.mrb[18].mxu0 }
0x1136   : > { %v1778_v38 = vmul.f32 %v1774_v37, %v1774_v37  ;;  %v2113_v39 = vpop.f32.mrb[19].mxu0 }
0x1138   : > { %v1780_v40 = vsel %vm1779_vm4, %v1778_v38, 0.0 }
0x1139   : > { %1781 = vadd.xlane.f32.xlu0 %v1780_v40 }
0x11c6   : > { %v1782_v50 = vpop.xlane.xlu0 %1781 }
0x11c7   : > { %v1783_v41 = vadd.f32 1e-12, %v1782_v50 }
0x11c9   : > { %2239 = vrsqrt.f32 %v1783_v41 }
0x11d3   : > { %v2240_v21 = vpop.eup %2239 }
0x11d4   : > { %v1785_v13 = vmul.f32 %v2240_v21, %v1774_v37 }
0x11d6   : > { %1786 = vst.msk [vmem:[%s241_s15] sm:$0x1] %vm1779_vm4, %v1785_v13 }
0x11d7   : > { %2254 = shalt.err (!%p2251_p3)
}
0x11d8   : > { %s2255_s9 = scalar_lea.hbm %s2693_s19, 16  ;;  %s2259_s12 = scalar_lea.hbm %s2742_s6, 32 }
0x11d9   : > { %p2256_p4 = scmp.ne.s32.totalorder %s2693_s19, %s2255_s9  ;;  %p2260_p9 = scmp.lt.u32.totalorder %s2693_s19, %s2742_s6 }
0x11da   : > { %p2261_p10 = scmp.lt.u32.totalorder %s2259_s12, %s2255_s9  ;;  %p2263_p12 = scmp.lt.u32.totalorder %s2255_s9, %s2693_s19 }
0x11db   : > { %p2257_p7 = pnand %p2256_p4, %p2385_p5 }
0x11dc   : > { %p2262_p11 = por %p2261_p10, %p2260_p9 }
0x11dd   : > { %p2258_p8 = pneg %p2257_p7 }
0x11de   : > { %p2264_p13 = por %p2263_p12, %p2262_p11 }
0x11e0   : > { %p2265_p0 = pnand %p2264_p13, %p2258_p8 }
0x11e2   : > { %2268 = shalt.err (!%p2265_p0)
}
0x11e3   : > { %2168 = dma.vmem_to_hbm [thread:$0]  (%p2385_p5), %s2695_s16, 16, %s2693_s19, %s1788_s20  }
0x11e4 PF: > { %p2174_p1 = scmp.ge.s32.totalorder %s2303_s24, 2  ;;  %s1812_s15 = sand.u32 1, %s2291_s21  }
0x11e5   : > { %s1813_s17 = scalar_lea.sflag [#allocation3], %s1812_s15 }
0x11e6   : > { %p2171_p2 = pnand %p2174_p1, %p2389_p6 }
0x11e8   : > { %2286 = dma.done.wait (!%p2171_p2), %s1813_s17, 16  }
0x11e9   : > { %2288 = vsyncadd (!%p2171_p2), %s1813_s17, 4294967280  ;;  %p16_p3 = scmp.ge.s32.totalorder %s2372_s27, 4   ;;  %s2745_s21 = smov %s2295_s22 }
0x11ea   : > { %s2746_s22 = smov %s2299_s23  ;;  %s2747_s23 = smov %s2383_s30 }
0x11eb   : > { %s2748_s24 = smov %s2372_s27  ;;  %18 = sbr.rel (!%p16_p3) target bundleno = 3 (0x3), region = 82 }
0x11f2   :  { %1817 = vsyncpa [#allocation3], 1 }
0x11f3   :  { %1819 = vsyncpa [#allocation3 + $0x1], 1 }

</bundles_post_ra>
